<compile_context>
chip_gen: v7x
topology: tpu7x:2x2x1
jax: 0.10.0
libtpu: 0.0.40
codegen_flags: <defaults>
</compile_context>

<pallas_src>
import functools

import jax
import jax.numpy as jnp
import numpy as np
from jax.experimental import pallas as pl
from jax.experimental.pallas import tpu as pltpu


def _date_embedding_kernel(ids_ref, table_ref, out_ref, *, batch, seq, max_pos):
    # ids_ref   : (B*S, 1)  int32   raw token ids
    # table_ref : (V*P, H)  float32 precomputed LN(word_emb[v]+pos_emb[p])*g+b
    # out_ref   : (B, H)    float32
    VP, H = table_ref.shape
    BS = ids_ref.shape[0]

    # Flat index into the precomputed table: flat = id * P + seq_position.
    ids = ids_ref[...]                                              # (BS, 1)
    row = jax.lax.broadcasted_iota(jnp.int32, (BS, 1), 0)           # (BS, 1)
    pos = row % seq                                                 # 0..S-1
    flat = ids * max_pos + pos                                      # (BS, 1)

    # Gather as one-hot @ table on the MXU (exact for 0/1 in f32).
    # NOTE: out-of-range / negative ids yield an all-zero row
    # (PyTorch nn.Embedding would error); fine for valid inputs.
    vp_iota = jax.lax.broadcasted_iota(jnp.int32, (BS, VP), 1)      # (BS, VP)
    onehot = (flat == vp_iota).astype(jnp.float32)                  # (BS, VP)
    vecs = jnp.dot(onehot, table_ref[...],
                   preferred_element_type=jnp.float32)              # (BS, H)

    # TODO(synk): dropout skipped (inference mode -> identity).
    # Max over the seq dim; single full-block unmasked store of (B, H).
    out_ref[...] = jnp.max(vecs.reshape(batch, seq, H), axis=1)


def make_date_embedding(word_emb, pos_emb, gamma, beta, eps=1e-12):
    """One-time parameter prep; returns a jitted forward(input_ids)->(B,H).

    Precomputes the fully LayerNormed (V*P, H) table so the per-call kernel
    is only a one-hot matmul + seq-max with 2 operands.
    """
    V, H = word_emb.shape
    P = pos_emb.shape[0]

    # --- One-time precompute (runs eagerly once, outside the hot path). ---
    w = word_emb.astype(jnp.float32)                       # (V, H)
    p = pos_emb.astype(jnp.float32)                        # (P, H)
    g = gamma.reshape(1, 1, H).astype(jnp.float32)
    b = beta.reshape(1, 1, H).astype(jnp.float32)

    emb = w[:, None, :] + p[None, :, :]                    # (V, P, H)
    mean = emb.mean(-1, keepdims=True)
    var = ((emb - mean) ** 2).mean(-1, keepdims=True)
    table = ((emb - mean) * jax.lax.rsqrt(var + eps)) * g + b
    table = table.reshape(V * P, H)                        # (V*P, H) f32

    vmem = pl.BlockSpec(memory_space=pltpu.MemorySpace.VMEM)

    @jax.jit
    def forward(input_ids):
        B, S = input_ids.shape
        if S > P:
            raise ValueError(
                f"seq_length {S} exceeds date_max_position_embeddings {P}")
        ids2 = input_ids.reshape(B * S, 1).astype(jnp.int32)
        kernel = functools.partial(_date_embedding_kernel,
                                   batch=B, seq=S, max_pos=P)
        return pl.pallas_call(
            kernel,
            out_shape=jax.ShapeDtypeStruct((B, H), jnp.float32),
            in_specs=[vmem, vmem],
            out_specs=vmem,
        )(ids2, table)

    return forward


def _reference_forward(input_ids, word_emb, pos_emb, gamma, beta, eps):
    # Pure-JAX reference mirroring the PyTorch forward (eval mode).
    B, S = input_ids.shape
    x = word_emb[input_ids]                      # (B, S, H)
    x = x + pos_emb[:S][None, :, :]
    mean = x.mean(-1, keepdims=True)
    var = ((x - mean) ** 2).mean(-1, keepdims=True)
    x = (x - mean) / jnp.sqrt(var + eps)
    x = x * gamma + beta
    return x.max(axis=1)                         # (B, H)


if __name__ == "__main__":
    # Config (synthetic, deterministic):
    DATE_VOCAB_SIZE = 64
    DATE_HIDDEN_SIZE = 32
    DATE_MAX_POS = 16
    PAD_TOKEN_ID = 0
    LAYER_NORM_EPS = 1e-12
    B, S = 2, 8

    key = jax.random.PRNGKey(0)
    k_ids, k_wemb, k_pemb = jax.random.split(key, 3)

    input_ids = jax.random.randint(k_ids, (B, S), 0, DATE_VOCAB_SIZE,
                                   dtype=jnp.int32)

    word_emb = 0.02 * jax.random.normal(
        k_wemb, (DATE_VOCAB_SIZE, DATE_HIDDEN_SIZE), dtype=jnp.float32)
    # padding_idx row is zero-initialized in nn.Embedding
    word_emb = word_emb.at[PAD_TOKEN_ID].set(0.0)

    pos_emb = 0.02 * jax.random.normal(
        k_pemb, (DATE_MAX_POS, DATE_HIDDEN_SIZE), dtype=jnp.float32)

    gamma = jnp.ones((DATE_HIDDEN_SIZE,), jnp.float32)   # LayerNorm weight
    beta = jnp.zeros((DATE_HIDDEN_SIZE,), jnp.float32)   # LayerNorm bias
    # NOTE: self.dense / self.activation are defined in __init__ but never
    # used in forward, so they are intentionally omitted.

    date_embedding = make_date_embedding(word_emb, pos_emb, gamma, beta,
                                         eps=LAYER_NORM_EPS)
    out = date_embedding(input_ids)
    out = jax.block_until_ready(out)

    ref = _reference_forward(input_ids, word_emb, pos_emb, gamma, beta,
                             LAYER_NORM_EPS)
    np.testing.assert_allclose(np.asarray(out), np.asarray(ref),
                               rtol=1e-5, atol=1e-5)

    print("KERNEL_OK")
</pallas_src>

<mosaic_0001>
module attributes {stable_mosaic.version = 11 : i64} {
  func.func @_date_embedding_kernel(%arg0: memref<16x1xi32, #tpu.memory_space<vmem>>, %arg1: memref<1024x32xf32, #tpu.memory_space<vmem>>, %arg2: memref<2x32xf32, #tpu.memory_space<vmem>>) attributes {dimension_semantics = [], scalar_prefetch = 0 : i64, scratch_operands = 0 : i64, tpu.core_type = #tpu.core_type<tc>} {
    %c0 = arith.constant 0 : index
    %c0_0 = arith.constant 0 : index
    %0 = vector.load %arg0[%c0, %c0_0] : memref<16x1xi32, #tpu.memory_space<vmem>>, vector<16x1xi32>
    %1 = tpu.iota {dimensions = array<i32: 0>} : vector<16x1xi32>
    %c8_i32 = arith.constant 8 : i32
    %c0_i32 = arith.constant 0 : i32
    %2 = arith.cmpi eq, %c8_i32, %c0_i32 : i32
    %c1_i32 = arith.constant 1 : i32
    %3 = arith.select %2, %c1_i32, %c8_i32 : i32
    %4 = vector.broadcast %3 : i32 to vector<16x1xi32>
    %5 = arith.remsi %1, %4 : vector<16x1xi32>
    %c0_i32_1 = arith.constant 0 : i32
    %6 = vector.broadcast %c0_i32_1 : i32 to vector<16x1xi32>
    %7 = arith.cmpi ne, %5, %6 : vector<16x1xi32>
    %c0_i32_2 = arith.constant 0 : i32
    %8 = vector.broadcast %c0_i32_2 : i32 to vector<16x1xi32>
    %9 = arith.cmpi slt, %5, %8 : vector<16x1xi32>
    %c0_i32_3 = arith.constant 0 : i32
    %10 = arith.cmpi slt, %3, %c0_i32_3 : i32
    %11 = vector.broadcast %10 : i1 to vector<16x1xi1>
    %12 = vector.broadcast %11 : vector<16x1xi1> to vector<16x1xi1>
    %13 = arith.xori %9, %12 : vector<16x1xi1>
    %14 = arith.andi %13, %7 : vector<16x1xi1>
    %15 = vector.broadcast %3 : i32 to vector<16x1xi32>
    %16 = arith.addi %5, %15 : vector<16x1xi32>
    %17 = arith.select %14, %16, %5 : vector<16x1xi1>, vector<16x1xi32>
    %c16_i32 = arith.constant 16 : i32
    %18 = vector.broadcast %c16_i32 : i32 to vector<16x1xi32>
    %19 = arith.muli %0, %18 : vector<16x1xi32>
    %20 = arith.addi %19, %17 : vector<16x1xi32>
    %21 = tpu.iota {dimensions = array<i32: 1>} : vector<16x1024xi32>
    %22 = vector.broadcast %20 : vector<16x1xi32> to vector<16x1024xi32>
    %23 = arith.cmpi eq, %22, %21 : vector<16x1024xi32>
    %24 = arith.extui %23 : vector<16x1024xi1> to vector<16x1024xi32>
    %25 = arith.sitofp %24 : vector<16x1024xi32> to vector<16x1024xf32>
    %c0_4 = arith.constant 0 : index
    %c0_5 = arith.constant 0 : index
    %26 = vector.load %arg1[%c0_4, %c0_5] : memref<1024x32xf32, #tpu.memory_space<vmem>>, vector<1024x32xf32>
    %cst = arith.constant dense<0.000000e+00> : vector<16x32xf32>
    %27 = tpu.matmul %25, %26, %cst {dimension_numbers = #tpu.dot_dimension_numbers<[1], [0], [0], [1], [0, 0, 1, 1], [], []>} : vector<16x1024xf32>, vector<1024x32xf32>, vector<16x32xf32> -> vector<16x32xf32>
    %28 = vector.shape_cast %27 : vector<16x32xf32> to vector<2x8x32xf32>
    %cst_6 = arith.constant dense<0xFF800000> : vector<2x32xf32>
    %29 = vector.multi_reduction <maximumf>, %28, %cst_6 [1] : vector<2x8x32xf32> to vector<2x32xf32>
    %c0_7 = arith.constant 0 : index
    %c0_8 = arith.constant 0 : index
    %30 = vector.load %arg2[%c0_7, %c0_8] : memref<2x32xf32, #tpu.memory_space<vmem>>, vector<2x32xf32>
    tpu.vector_store %arg2[%c0_7, %c0_8], %29 {strides = array<i32>} : memref<2x32xf32, #tpu.memory_space<vmem>>, vector<2x32xf32>,
    return
  }
}

</mosaic_0001>

<bundles_post_ra>
// kernel: forward.1
= control target key start
LH: loop header
LB: loop body
LE: loop exit
PB: predicated region body
PF: predicated region fallthrough
CT: control target
= control target key end

     0   :  { %7 = vsyncpa [#allocation3], 0  ;;  %s1062_s0 = inlined_call_operand.vmem [shape: s32[16,1], index: 0, kind: input, shape index: {}]   ;;  %s1063_s1 = inlined_call_operand.hbm [shape: f32[1024,32], index: 1, kind: input, shape index: {}]   ;;  %s1064_s2 = inlined_call_operand.hbm [shape: f32[2,32], index: 2, kind: output, shape index: {}]  }
   0x1   :  { %8 = vsyncpa [#allocation4], 0  ;;  %s954_s9 = smov [#allocation2]   ;;  %s906_s13 = scalar_lea.hbm %s1063_s1, 16384 }
   0x2   :  { %s16_s10 = sshll.u32 %s954_s9, 4  ;;  %p907_p0 = scmp.ne.s32.totalorder %s1063_s1, %s906_s13  ;;  %s17_s10 = int_to_ptr.vmem [resolvable:$true] %s16_s10 }
   0x3   :  { %p910_p1 = scmp.lt.u32.totalorder %s906_s13, %s1063_s1 }
   0x5   :  { %p912_p2 = pnand %p910_p1, %p907_p0 }
   0x7   :  { %915 = shalt.err (!%p912_p2)
}
   0x8   :  { %s916_s18 = scalar_lea.vmem %s17_s10, 16384  ;;  %p921_p4 = scmp.lt.s32.totalorder %s17_s10, %s17_s10 }
   0x9   :  { %p917_p3 = scmp.ne.s32.totalorder %s17_s10, %s916_s18  ;;  %p922_p5 = scmp.lt.s32.totalorder %s916_s18, %s916_s18 }
   0xb   :  { %p923_p6 = por %p922_p5, %p921_p4 }
   0xd   :  { %p924_p7 = pnand %p923_p6, %p917_p3 }
   0xf   :  { %927 = shalt.err (!%p924_p7)
}
  0x10   :  { %s955_s19 = smov 128   ;;  %s956_s20 = smov 8  }
  0x11   :  { %22 = dma.hbm_to_vmem [thread:$0]  %s1063_s1, 16384, %s17_s10, [#allocation3], %s955_s19, %s955_s19, %s956_s20  }
  0x12   :  { %950 = dma.done.wait [#allocation3], 16384  }
  0x13   :  { %951 = vsyncadd [#allocation3], 4294950912  ;;  %v28_v0 = vlaneseq  ;;  %v957_v1 = vmov 0   ;;  %v26_v5 = vld [vmem:[%s1062_s0] sm:$0xff]  ;;  %v27_v6 = vld [vmem:[%s1062_s0 + $0x8] sm:$0xff]  ;;  %s959_s0 = smov [#allocation5]  }
  0x14   :  { %905 = vset.pattern.permute.xlu0 %v957_v1  ;;  %v138_v7 = vld [vmem:[#allocation2 + $0x80] sm:$0xff]  ;;  %v55_v8 = vmul.u32 16, %v26_v5  ;;  %v56_v10 = vmul.u32 16, %v27_v6  ;;  %v139_v11 = vld [vmem:[#allocation2 + $0x88] sm:$0xff]  ;;  %v140_v22 = vld [vmem:[#allocation2 + $0x90] sm:$0xff]  ;;  %s578_s1 = sshll.u32 %s959_s0, 4  ;;  %s579_s1 = int_to_ptr.vmem [resolvable:$true] %s578_s1 }
  0x15   :  { %v29_v2 = vshrl.u32 %v28_v0, 7  ;;  %v170_v12 = vld [vmem:[#allocation2 + $0x180] sm:$0xff]  ;;  %v171_v13 = vld [vmem:[#allocation2 + $0x188] sm:$0xff]  ;;  %v771_v14 = vpack.c.bf16 %v139_v11, %v138_v7  ;;  %v141_v23 = vld [vmem:[#allocation2 + $0x98] sm:$0xff]  ;;  %s928_s27 = scalar_lea.vmem %s579_s1, 32  ;;  %p933_p9 = scmp.lt.s32.totalorder %s579_s1, %s579_s1 }
  0x16   :  { %v803_v15 = vpack.c.bf16 %v171_v13, %v170_v12  ;;  %v122_v16 = vld [vmem:[#allocation2] sm:$0xff]  ;;  %v123_v17 = vld [vmem:[#allocation2 + $0x8] sm:$0xff]  ;;  %v775_v25 = vpack.c.bf16 %v141_v23, %v140_v22  ;;  %v172_v26 = vld [vmem:[#allocation2 + $0x190] sm:$0xff]  ;;  %p929_p8 = scmp.ne.s32.totalorder %s579_s1, %s928_s27  ;;  %p934_p10 = scmp.lt.s32.totalorder %s928_s27, %s928_s27 }
  0x17   :  { %v30_v3 = vadd.s32 8, %v29_v2  ;;  %v35_v4 = vand.u32 7, %v29_v2  ;;  %v154_v18 = vld [vmem:[#allocation2 + $0x100] sm:$0xff]  ;;  %v773_v20 = vpack.c.bf16 %v123_v17, %v122_v16  ;;  %v155_v21 = vld [vmem:[#allocation2 + $0x108] sm:$0xff]  ;;  %772 = vmatprep.subr.bf16.mxu0 %v771_v14  ;;  %v173_v27 = vld [vmem:[#allocation2 + $0x198] sm:$0xff] }
  0x18   :  { %804 = vmatprep.subr.bf16.mxu1 %v803_v15  ;;  %v805_v24 = vpack.c.bf16 %v155_v21, %v154_v18  ;;  %v124_v28 = vld [vmem:[#allocation2 + $0x10] sm:$0xff]  ;;  %v807_v30 = vpack.c.bf16 %v173_v27, %v172_v26  ;;  %v125_v31 = vld [vmem:[#allocation2 + $0x18] sm:$0xff]  ;;  %v142_v36 = vld [vmem:[#allocation2 + $0xa0] sm:$0xff]  ;;  %p935_p11 = por %p934_p10, %p933_p9 }
  0x19   :  { %v42_v9 = vand.u32 7, %v30_v3  ;;  %v57_v19 = vadd.s32 %v55_v8, %v35_v4  ;;  %774 = vmatpush3.bf16.msra.mxu0 %v773_v20  ;;  %v156_v32 = vld [vmem:[#allocation2 + $0x110] sm:$0xff]  ;;  %v157_v33 = vld [vmem:[#allocation2 + $0x118] sm:$0xff]  ;;  %v777_v34 = vpack.c.bf16 %v125_v31, %v124_v28  ;;  %v143_v37 = vld [vmem:[#allocation2 + $0xa8] sm:$0xff] }
  0x1a   :  { %806 = vmatpush3.bf16.msra.mxu1 %v805_v24  ;;  %776 = vmatprep.subr.bf16.mxu0 %v775_v25  ;;  %v809_v35 = vpack.c.bf16 %v157_v33, %v156_v32  ;;  %v174_v38 = vld [vmem:[#allocation2 + $0x1a0] sm:$0xff]  ;;  %v779_v39 = vpack.c.bf16 %v143_v37, %v142_v36  ;;  %v175_v40 = vld [vmem:[#allocation2 + $0x1a8] sm:$0xff]  ;;  %v144_v46 = vld [vmem:[#allocation2 + $0xb0] sm:$0xff]  ;;  %p936_p12 = pnand %p935_p11, %p929_p8 }
  0x1b   :  { %69 = vperm.xlu0 %905, %v57_v19   ;;  %v58_v29 = vadd.s32 %v56_v10, %v42_v9  ;;  %808 = vmatprep.subr.bf16.mxu1 %v807_v30  ;;  %v126_v41 = vld [vmem:[#allocation2 + $0x20] sm:$0xff]  ;;  %v127_v42 = vld [vmem:[#allocation2 + $0x28] sm:$0xff]  ;;  %v811_v43 = vpack.c.bf16 %v175_v40, %v174_v38  ;;  %v145_v48 = vld [vmem:[#allocation2 + $0xb8] sm:$0xff] }
  0x1c   :  { %v158_v44 = vld [vmem:[#allocation2 + $0x120] sm:$0xff]  ;;  %v159_v45 = vld [vmem:[#allocation2 + $0x128] sm:$0xff]  ;;  %v781_v47 = vpack.c.bf16 %v127_v42, %v126_v41  ;;  %v176_v49 = vld [vmem:[#allocation2 + $0x1b0] sm:$0xff]  ;;  %v783_v52 = vpack.c.bf16 %v145_v48, %v144_v46 }
  0x1d   :  { %778 = vmatpush3.bf16.msra.mxu0 %v777_v34  ;;  %v177_v50 = vld [vmem:[#allocation2 + $0x1b8] sm:$0xff]  ;;  %v813_v51 = vpack.c.bf16 %v159_v45, %v158_v44  ;;  %v128_v53 = vld [vmem:[#allocation2 + $0x30] sm:$0xff]  ;;  %v146_v58 = vld [vmem:[#allocation2 + $0xc0] sm:$0xff] }
  0x1e   :  { %810 = vmatpush3.bf16.msra.mxu1 %v809_v35  ;;  %780 = vmatprep.subr.bf16.mxu0 %v779_v39  ;;  %v129_v54 = vld [vmem:[#allocation2 + $0x38] sm:$0xff]  ;;  %v160_v55 = vld [vmem:[#allocation2 + $0x130] sm:$0xff]  ;;  %v815_v56 = vpack.c.bf16 %v177_v50, %v176_v49  ;;  %v147_v59 = vld [vmem:[#allocation2 + $0xc8] sm:$0xff] }
  0x1f   :  { %72 = vperm.xlu0 %905, %v58_v29   ;;  %812 = vmatprep.subr.bf16.mxu1 %v811_v43  ;;  %v161_v57 = vld [vmem:[#allocation2 + $0x138] sm:$0xff]  ;;  %v178_v60 = vld [vmem:[#allocation2 + $0x1c0] sm:$0xff]  ;;  %v179_v61 = vld [vmem:[#allocation2 + $0x1c8] sm:$0xff]  ;;  %v785_v62 = vpack.c.bf16 %v129_v54, %v128_v53  ;;  %v787_v1 = vpack.c.bf16 %v147_v59, %v146_v58 }
  0x20   :  { %v817_v63 = vpack.c.bf16 %v161_v57, %v160_v55  ;;  %v130_v2 = vld [vmem:[#allocation2 + $0x40] sm:$0xff]  ;;  %v131_v3 = vld [vmem:[#allocation2 + $0x48] sm:$0xff]  ;;  %v819_v5 = vpack.c.bf16 %v179_v61, %v178_v60  ;;  %v148_v7 = vld [vmem:[#allocation2 + $0xd0] sm:$0xff] }
  0x21   :  { %782 = vmatpush3.bf16.msra.mxu0 %v781_v47  ;;  %v162_v4 = vld [vmem:[#allocation2 + $0x140] sm:$0xff]  ;;  %v163_v6 = vld [vmem:[#allocation2 + $0x148] sm:$0xff]  ;;  %v149_v8 = vld [vmem:[#allocation2 + $0xd8] sm:$0xff]  ;;  %v789_v11 = vpack.c.bf16 %v131_v3, %v130_v2 }
  0x22   :  { %814 = vmatpush3.bf16.msra.mxu1 %v813_v51  ;;  %784 = vmatprep.subr.bf16.mxu0 %v783_v52  ;;  %v180_v9 = vld [vmem:[#allocation2 + $0x1d0] sm:$0xff]  ;;  %v181_v10 = vld [vmem:[#allocation2 + $0x1d8] sm:$0xff]  ;;  %v821_v12 = vpack.c.bf16 %v163_v6, %v162_v4  ;;  %v791_v13 = vpack.c.bf16 %v149_v8, %v148_v7  ;;  %v150_v19 = vld [vmem:[#allocation2 + $0xe0] sm:$0xff]  ;;  %v995_v51 = vand.u32 127, %v28_v0  ;;  %v958_v8 = vmov 1.0  }
  0x23   :  { %816 = vmatprep.subr.bf16.mxu1 %v815_v56  ;;  %v132_v14 = vld [vmem:[#allocation2 + $0x50] sm:$0xff]  ;;  %v133_v15 = vld [vmem:[#allocation2 + $0x58] sm:$0xff]  ;;  %v823_v17 = vpack.c.bf16 %v181_v10, %v180_v9  ;;  %v151_v20 = vld [vmem:[#allocation2 + $0xe8] sm:$0xff] }
  0x24   :  { %v164_v16 = vld [vmem:[#allocation2 + $0x150] sm:$0xff]  ;;  %v165_v18 = vld [vmem:[#allocation2 + $0x158] sm:$0xff]  ;;  %v182_v21 = vld [vmem:[#allocation2 + $0x1e0] sm:$0xff]  ;;  %v793_v23 = vpack.c.bf16 %v133_v15, %v132_v14  ;;  %v795_v25 = vpack.c.bf16 %v151_v20, %v150_v19  ;;  %v61_v57 = vadd.s32 128, %v995_v51  ;;  %v63_v58 = vadd.s32 384, %v995_v51 }
  0x25   :  { %786 = vmatpush3.bf16.msra.mxu0 %v785_v62  ;;  %v183_v22 = vld [vmem:[#allocation2 + $0x1e8] sm:$0xff]  ;;  %v825_v24 = vpack.c.bf16 %v165_v18, %v164_v16  ;;  %v134_v26 = vld [vmem:[#allocation2 + $0x60] sm:$0xff]  ;;  %v152_v31 = vld [vmem:[#allocation2 + $0xf0] sm:$0xff]  ;;  %v62_v59 = vadd.s32 256, %v995_v51  ;;  %v1014_v16 = vadd.s32 640, %v995_v51 }
  0x26   :  { %818 = vmatpush3.bf16.msra.mxu1 %v817_v63  ;;  %788 = vmatprep.subr.bf16.mxu0 %v787_v1  ;;  %v135_v27 = vld [vmem:[#allocation2 + $0x68] sm:$0xff]  ;;  %v166_v28 = vld [vmem:[#allocation2 + $0x160] sm:$0xff]  ;;  %v827_v29 = vpack.c.bf16 %v183_v22, %v182_v21  ;;  %v153_v32 = vld [vmem:[#allocation2 + $0xf8] sm:$0xff] }
  0x27   :  { %820 = vmatprep.subr.bf16.mxu1 %v819_v5  ;;  %v167_v30 = vld [vmem:[#allocation2 + $0x168] sm:$0xff]  ;;  %v184_v33 = vld [vmem:[#allocation2 + $0x1f0] sm:$0xff]  ;;  %v185_v34 = vld [vmem:[#allocation2 + $0x1f8] sm:$0xff]  ;;  %v797_v35 = vpack.c.bf16 %v135_v27, %v134_v26  ;;  %v799_v37 = vpack.c.bf16 %v153_v32, %v152_v31 }
  0x28   :  { %v829_v36 = vpack.c.bf16 %v167_v30, %v166_v28  ;;  %v136_v38 = vld [vmem:[#allocation2 + $0x70] sm:$0xff]  ;;  %v137_v39 = vld [vmem:[#allocation2 + $0x78] sm:$0xff]  ;;  %v831_v41 = vpack.c.bf16 %v185_v34, %v184_v33  ;;  %v202_v43 = vld [vmem:[#allocation2 + $0x280] sm:$0xff] }
  0x29   :  { %790 = vmatpush3.bf16.msra.mxu0 %v789_v11  ;;  %v168_v40 = vld [vmem:[#allocation2 + $0x170] sm:$0xff]  ;;  %v169_v42 = vld [vmem:[#allocation2 + $0x178] sm:$0xff]  ;;  %v203_v44 = vld [vmem:[#allocation2 + $0x288] sm:$0xff]  ;;  %v801_v47 = vpack.c.bf16 %v137_v39, %v136_v38 }
  0x2a   :  { %822 = vmatpush3.bf16.msra.mxu1 %v821_v12  ;;  %792 = vmatprep.subr.bf16.mxu0 %v791_v13  ;;  %v234_v45 = vld [vmem:[#allocation2 + $0x380] sm:$0xff]  ;;  %v235_v46 = vld [vmem:[#allocation2 + $0x388] sm:$0xff]  ;;  %v833_v48 = vpack.c.bf16 %v169_v42, %v168_v40  ;;  %v835_v49 = vpack.c.bf16 %v203_v44, %v202_v43  ;;  %v204_v56 = vld [vmem:[#allocation2 + $0x290] sm:$0xff] }
  0x2b   :  { %824 = vmatprep.subr.bf16.mxu1 %v823_v17  ;;  %v867_v50 = vpack.c.bf16 %v235_v46, %v234_v45  ;;  %v186_v52 = vld [vmem:[#allocation2 + $0x200] sm:$0xff]  ;;  %v187_v53 = vld [vmem:[#allocation2 + $0x208] sm:$0xff]  ;;  %v205_v60 = vld [vmem:[#allocation2 + $0x298] sm:$0xff]  ;;  %v1017_v17 = vadd.s32 896, %v995_v51 }
  0x2c   :  { %v218_v54 = vld [vmem:[#allocation2 + $0x300] sm:$0xff]  ;;  %v219_v55 = vld [vmem:[#allocation2 + $0x308] sm:$0xff]  ;;  %v236_v61 = vld [vmem:[#allocation2 + $0x390] sm:$0xff]  ;;  %v837_v1 = vpack.c.bf16 %v187_v53, %v186_v52  ;;  %v839_v0 = vpack.c.bf16 %v205_v60, %v204_v56 }
  0x2d   :  { %794 = vmatpush3.bf16.msra.mxu0 %v793_v23  ;;  %v237_v62 = vld [vmem:[#allocation2 + $0x398] sm:$0xff]  ;;  %v869_v2 = vpack.c.bf16 %v219_v55, %v218_v54  ;;  %v188_v4 = vld [vmem:[#allocation2 + $0x210] sm:$0xff]  ;;  %v206_v9 = vld [vmem:[#allocation2 + $0x2a0] sm:$0xff] }
  0x2e   :  { %826 = vmatpush3.bf16.msra.mxu1 %v825_v24  ;;  %796 = vmatprep.subr.bf16.mxu0 %v795_v25  ;;  %v871_v3 = vpack.c.bf16 %v237_v62, %v236_v61  ;;  %v189_v5 = vld [vmem:[#allocation2 + $0x218] sm:$0xff]  ;;  %v220_v6 = vld [vmem:[#allocation2 + $0x310] sm:$0xff]  ;;  %v207_v10 = vld [vmem:[#allocation2 + $0x2a8] sm:$0xff] }
  0x2f   :  { %828 = vmatprep.subr.bf16.mxu1 %v827_v29  ;;  %v221_v7 = vld [vmem:[#allocation2 + $0x318] sm:$0xff]  ;;  %v238_v11 = vld [vmem:[#allocation2 + $0x3a0] sm:$0xff]  ;;  %v239_v12 = vld [vmem:[#allocation2 + $0x3a8] sm:$0xff]  ;;  %v841_v14 = vpack.c.bf16 %v189_v5, %v188_v4  ;;  %v843_v23 = vpack.c.bf16 %v207_v10, %v206_v9 }
  0x30   :  { %v873_v15 = vpack.c.bf16 %v221_v7, %v220_v6  ;;  %v190_v18 = vld [vmem:[#allocation2 + $0x220] sm:$0xff]  ;;  %v191_v19 = vld [vmem:[#allocation2 + $0x228] sm:$0xff]  ;;  %v208_v22 = vld [vmem:[#allocation2 + $0x2b0] sm:$0xff]  ;;  %v875_v24 = vpack.c.bf16 %v239_v12, %v238_v11 }
  0x31   :  { %798 = vmatpush3.bf16.msra.mxu0 %v797_v35  ;;  %v222_v20 = vld [vmem:[#allocation2 + $0x320] sm:$0xff]  ;;  %v223_v21 = vld [vmem:[#allocation2 + $0x328] sm:$0xff]  ;;  %v209_v25 = vld [vmem:[#allocation2 + $0x2b8] sm:$0xff]  ;;  %v845_v28 = vpack.c.bf16 %v191_v19, %v190_v18 }
  0x32   :  { %830 = vmatpush3.bf16.msra.mxu1 %v829_v36  ;;  %800 = vmatprep.subr.bf16.mxu0 %v799_v37  ;;  %v240_v26 = vld [vmem:[#allocation2 + $0x3b0] sm:$0xff]  ;;  %v241_v27 = vld [vmem:[#allocation2 + $0x3b8] sm:$0xff]  ;;  %v877_v29 = vpack.c.bf16 %v223_v21, %v222_v20  ;;  %v847_v32 = vpack.c.bf16 %v209_v25, %v208_v22  ;;  %v210_v36 = vld [vmem:[#allocation2 + $0x2c0] sm:$0xff] }
  0x33   :  { %832 = vmatprep.subr.bf16.mxu1 %v831_v41  ;;  %v192_v30 = vld [vmem:[#allocation2 + $0x230] sm:$0xff]  ;;  %v193_v31 = vld [vmem:[#allocation2 + $0x238] sm:$0xff]  ;;  %v879_v33 = vpack.c.bf16 %v241_v27, %v240_v26  ;;  %v211_v37 = vld [vmem:[#allocation2 + $0x2c8] sm:$0xff] }
  0x34   :  { %v224_v34 = vld [vmem:[#allocation2 + $0x330] sm:$0xff]  ;;  %v225_v35 = vld [vmem:[#allocation2 + $0x338] sm:$0xff]  ;;  %v242_v38 = vld [vmem:[#allocation2 + $0x3c0] sm:$0xff]  ;;  %v849_v40 = vpack.c.bf16 %v193_v31, %v192_v30  ;;  %v851_v44 = vpack.c.bf16 %v211_v37, %v210_v36 }
  0x35   :  { %802 = vmatpush3.bf16.msra.mxu0 %v801_v47  ;;  %v243_v39 = vld [vmem:[#allocation2 + $0x3c8] sm:$0xff]  ;;  %v881_v41 = vpack.c.bf16 %v225_v35, %v224_v34  ;;  %v194_v42 = vld [vmem:[#allocation2 + $0x240] sm:$0xff]  ;;  %v245_v52 = vld [vmem:[#allocation2 + $0x3d8] sm:$0xff] }
  0x36   :  { %834 = vmatpush3.bf16.msra.mxu1 %v833_v48  ;;  %836 = vmatprep.subr.bf16.mxu0 %v835_v49  ;;  %v195_v43 = vld [vmem:[#allocation2 + $0x248] sm:$0xff]  ;;  %v883_v45 = vpack.c.bf16 %v243_v39, %v242_v38  ;;  %v226_v46 = vld [vmem:[#allocation2 + $0x340] sm:$0xff]  ;;  %v212_v48 = vld [vmem:[#allocation2 + $0x2d0] sm:$0xff] }
  0x37   :  { %868 = vmatprep.subr.bf16.mxu1 %v867_v50  ;;  %v227_v47 = vld [vmem:[#allocation2 + $0x348] sm:$0xff]  ;;  %v213_v49 = vld [vmem:[#allocation2 + $0x2d8] sm:$0xff]  ;;  %v244_v50 = vld [vmem:[#allocation2 + $0x3d0] sm:$0xff]  ;;  %v853_v53 = vpack.c.bf16 %v195_v43, %v194_v42 }
  0x38   :  { %v885_v54 = vpack.c.bf16 %v227_v47, %v226_v46  ;;  %v196_v55 = vld [vmem:[#allocation2 + $0x250] sm:$0xff]  ;;  %v197_v56 = vld [vmem:[#allocation2 + $0x258] sm:$0xff]  ;;  %v214_v61 = vld [vmem:[#allocation2 + $0x2e0] sm:$0xff] }
  0x39   :  { %v229_v60 = vld [vmem:[#allocation2 + $0x358] sm:$0xff]  ;;  %v215_v62 = vld [vmem:[#allocation2 + $0x2e8] sm:$0xff]  ;;  %v198_v4 = vld [vmem:[#allocation2 + $0x260] sm:$0xff] }
  0x3a   :  { %v199_v5 = vld [vmem:[#allocation2 + $0x268] sm:$0xff]  ;;  %v859_v6 = vpack.c.bf16 %v215_v62, %v214_v61  ;;  %v230_v9 = vld [vmem:[#allocation2 + $0x360] sm:$0xff]  ;;  %v216_v11 = vld [vmem:[#allocation2 + $0x2f0] sm:$0xff] }
  0x3b   :  { %v231_v10 = vld [vmem:[#allocation2 + $0x368] sm:$0xff]  ;;  %v217_v12 = vld [vmem:[#allocation2 + $0x2f8] sm:$0xff]  ;;  %v861_v18 = vpack.c.bf16 %v199_v5, %v198_v4  ;;  %v200_v20 = vld [vmem:[#allocation2 + $0x270] sm:$0xff] }
  0x3c   :  { %v893_v19 = vpack.c.bf16 %v231_v10, %v230_v9  ;;  %v863_v21 = vpack.c.bf16 %v217_v12, %v216_v11  ;;  %v233_v25 = vld [vmem:[#allocation2 + $0x378] sm:$0xff] }
  0x9a   :  { %v1000_v63 = vpop.permute.xlu0 %69 }
  0x9b   :  { %vm75_vm0 = vcmp.eq.s32.totalorder %v1000_v63, %v61_v57  ;;  %vm77_vm1 = vcmp.eq.s32.totalorder %v1000_v63, %v63_v58  ;;  %vm74_vm2 = vcmp.eq.s32.totalorder %v1000_v63, %v995_v51  ;;  %vm76_vm3 = vcmp.eq.s32.totalorder %v1000_v63, %v62_v59 }
  0x9c   :  { %603 = vmatprep.mubr.msk.f32.mxu0 %vm75_vm0, %v958_v8  ;;  %607 = vmatprep.mubr.msk.f32.mxu1 %vm77_vm1, %v958_v8  ;;  %vm79_vm8 = vcmp.eq.s32.totalorder %v1000_v63, %v1014_v16  ;;  %vm81_vm9 = vcmp.eq.s32.totalorder %v1000_v63, %v1017_v17  ;;  %vm550_vm0 = vcmask 261120   ;;  %vm567_vm1 = vcmask 1041409  }
  0x9d   :  { %604 = vmatmul.mubr.msk.f32.vlgmr.msra.gmra.mrb[0].mxu0 %vm74_vm2, %v958_v8  ;;  %608 = vmatmul.mubr.msk.f32.vlgmr.msra.gmra.mrb[0].mxu1 %vm76_vm3, %v958_v8  ;;  %vm570_vm2 = vcmask 254976  }
  0x9e   :  { %838 = vmatpush3.bf16.msra.mxu0 %v837_v1  ;;  %870 = vmatpush3.bf16.msra.mxu1 %v869_v2  ;;  %v1011_v13 = vpop.permute.xlu0 %72  ;;  %v246_v1 = vld [vmem:[#allocation2 + $0x3e0] sm:$0xff]  ;;  %v247_v2 = vld [vmem:[#allocation2 + $0x3e8] sm:$0xff] }
  0x9f   :  { %vm83_vm4 = vcmp.eq.s32.totalorder %v1011_v13, %v61_v57  ;;  %vm85_vm5 = vcmp.eq.s32.totalorder %v1011_v13, %v63_v58  ;;  %840 = vmatprep.subr.bf16.mxu0 %v839_v0  ;;  %872 = vmatprep.subr.bf16.mxu1 %v871_v3  ;;  %vm82_vm6 = vcmp.eq.s32.totalorder %v1011_v13, %v995_v51 }
  0xa0   :  { %605 = vmatprep.mubr.msk.f32.mxu0 %vm83_vm4, %v958_v8  ;;  %609 = vmatprep.mubr.msk.f32.mxu1 %vm85_vm5, %v958_v8  ;;  %vm84_vm7 = vcmp.eq.s32.totalorder %v1011_v13, %v62_v59  ;;  %v855_v57 = vpack.c.bf16 %v213_v49, %v212_v48  ;;  %v887_v58 = vpack.c.bf16 %v245_v52, %v244_v50  ;;  %v228_v59 = vld [vmem:[#allocation2 + $0x350] sm:$0xff] }
  0xa1   :  { %606 = vmatmul.mubr.msk.f32.gmra.mrb[2].mxu0 %vm82_vm6, %v958_v8  ;;  %610 = vmatmul.mubr.msk.f32.gmra.mrb[2].mxu1 %vm84_vm7, %v958_v8  ;;  %v857_v0 = vpack.c.bf16 %v197_v56, %v196_v55  ;;  %v889_v3 = vpack.c.bf16 %v229_v60, %v228_v59  ;;  %v891_v7 = vpack.c.bf16 %v247_v2, %v246_v1 }
  0xa2   :  { %842 = vmatpush3.bf16.msra.mxu0 %v841_v14  ;;  %874 = vmatpush3.bf16.msra.mxu1 %v873_v15  ;;  %v248_v14 = vld [vmem:[#allocation2 + $0x3f0] sm:$0xff]  ;;  %v249_v15 = vld [vmem:[#allocation2 + $0x3f8] sm:$0xff]  ;;  %vm87_vm12 = vcmp.eq.s32.totalorder %v1011_v13, %v1014_v16  ;;  %vm89_vm13 = vcmp.eq.s32.totalorder %v1011_v13, %v1017_v17 }
  0xa3   :  { %611 = vmatprep.mubr.msk.f32.mxu0 %vm79_vm8, %v958_v8  ;;  %615 = vmatprep.mubr.msk.f32.mxu1 %vm81_vm9, %v958_v8  ;;  %v895_v22 = vpack.c.bf16 %v249_v15, %v248_v14 }
  0xa4   :  { %844 = vmatprep.subr.bf16.mxu0 %v843_v23  ;;  %876 = vmatprep.subr.bf16.mxu1 %v875_v24  ;;  %v201_v23 = vld [vmem:[#allocation2 + $0x278] sm:$0xff]  ;;  %v232_v24 = vld [vmem:[#allocation2 + $0x370] sm:$0xff] }
  0xa5   :  { %v865_v26 = vpack.c.bf16 %v201_v23, %v200_v20  ;;  %v897_v27 = vpack.c.bf16 %v233_v25, %v232_v24 }
  0xa6   :  { %846 = vmatpush3.bf16.msra.mxu0 %v845_v28  ;;  %878 = vmatpush3.bf16.msra.mxu1 %v877_v29  ;;  %v64_v28 = vadd.s32 512, %v995_v51  ;;  %v66_v29 = vadd.s32 768, %v995_v51 }
  0xa7   :  { %848 = vmatprep.subr.bf16.mxu0 %v847_v32  ;;  %880 = vmatprep.subr.bf16.mxu1 %v879_v33 }
  0xa8   :  { %vm78_vm10 = vcmp.eq.s32.totalorder %v1000_v63, %v64_v28  ;;  %vm80_vm11 = vcmp.eq.s32.totalorder %v1000_v63, %v66_v29  ;;  %vm86_vm14 = vcmp.eq.s32.totalorder %v1011_v13, %v64_v28  ;;  %vm88_vm15 = vcmp.eq.s32.totalorder %v1011_v13, %v66_v29 }
  0xaa   :  { %850 = vmatpush3.bf16.msra.mxu0 %v849_v40  ;;  %882 = vmatpush3.bf16.msra.mxu1 %v881_v41 }
  0xab   :  { %852 = vmatprep.subr.bf16.mxu0 %v851_v44  ;;  %884 = vmatprep.subr.bf16.mxu1 %v883_v45 }
  0xae   :  { %854 = vmatpush3.bf16.msra.mxu0 %v853_v53  ;;  %886 = vmatpush3.bf16.msra.mxu1 %v885_v54 }
  0xaf   :  { %856 = vmatprep.subr.bf16.mxu0 %v855_v57  ;;  %888 = vmatprep.subr.bf16.mxu1 %v887_v58 }
  0xb2   :  { %858 = vmatpush3.bf16.msra.mxu0 %v857_v0  ;;  %890 = vmatpush3.bf16.msra.mxu1 %v889_v3 }
  0xb3   :  { %860 = vmatprep.subr.bf16.mxu0 %v859_v6  ;;  %892 = vmatprep.subr.bf16.mxu1 %v891_v7 }
  0xb6   :  { %862 = vmatpush3.bf16.msra.mxu0 %v861_v18  ;;  %894 = vmatpush3.bf16.msra.mxu1 %v893_v19 }
  0xb7   :  { %864 = vmatprep.subr.bf16.mxu0 %v863_v21  ;;  %896 = vmatprep.subr.bf16.mxu1 %v895_v22 }
  0xba   :  { %866 = vmatpush3.bf16.msra.mxu0 %v865_v26  ;;  %898 = vmatpush3.bf16.msra.mxu1 %v897_v27 }
  0xbd   :  { %612 = vmatmul.mubr.msk.f32.vlgmr.msra.gmra.mrb[4].mxu0 %vm78_vm10, %v958_v8  ;;  %616 = vmatmul.mubr.msk.f32.vlgmr.msra.gmra.mrb[4].mxu1 %vm80_vm11, %v958_v8 }
  0xbe   :  { %613 = vmatprep.mubr.msk.f32.mxu0 %vm87_vm12, %v958_v8  ;;  %617 = vmatprep.mubr.msk.f32.mxu1 %vm89_vm13, %v958_v8 }
  0xc1   :  { %614 = vmatmul.mubr.msk.f32.gmra.mrb[6].mxu0 %vm86_vm14, %v958_v8  ;;  %618 = vmatmul.mubr.msk.f32.gmra.mrb[6].mxu1 %vm88_vm15, %v958_v8 }
 0x170   :  { %v651_v51 = vpop.f32.mrb[0].mxu0  ;;  %v689_v63 = vpop.f32.mrb[0].mxu1 }
 0x171   :  { %v652_v30 = vpop.f32.mrb[1].mxu0  ;;  %v690_v31 = vpop.f32.mrb[1].mxu1 }
 0x172   :  { %v653_v16 = vadd.f32 %v652_v30, %v651_v51  ;;  %v691_v32 = vadd.f32 %v690_v31, %v689_v63 }
 0x174   :  { %v392_v33 = vadd.f32 %v691_v32, %v653_v16  ;;  %v654_v17 = vpop.f32.mrb[2].mxu0  ;;  %v692_v34 = vpop.f32.mrb[2].mxu1 }
 0x175   :  { %v655_v35 = vpop.f32.mrb[3].mxu0  ;;  %v693_v36 = vpop.f32.mrb[3].mxu1 }
 0x176   :  { %v656_v37 = vadd.f32 %v655_v35, %v654_v17  ;;  %v694_v38 = vadd.f32 %v693_v36, %v692_v34 }
 0x178   :  { %v397_v39 = vadd.f32 %v694_v38, %v656_v37 }
 0x190   :  { %v727_v40 = vpop.f32.mrb[4].mxu0  ;;  %v765_v13 = vpop.f32.mrb[4].mxu1 }
 0x191   :  { %v728_v41 = vpop.f32.mrb[5].mxu0  ;;  %v766_v42 = vpop.f32.mrb[5].mxu1 }
 0x192   :  { %v729_v43 = vadd.f32 %v728_v41, %v727_v40  ;;  %v767_v8 = vadd.f32 %v766_v42, %v765_v13 }
 0x194   :  { %v467_v44 = vadd.f32 %v729_v43, %v392_v33  ;;  %v730_v45 = vpop.f32.mrb[6].mxu0  ;;  %v768_v46 = vpop.f32.mrb[6].mxu1 }
 0x195   :  { %v731_v47 = vpop.f32.mrb[7].mxu0  ;;  %v769_v48 = vpop.f32.mrb[7].mxu1 }
 0x196   :  { %v542_v49 = vadd.f32 %v767_v8, %v467_v44  ;;  %v732_v50 = vadd.f32 %v731_v47, %v730_v45  ;;  %v770_v52 = vadd.f32 %v769_v48, %v768_v46 }
 0x198   :  { %v551_v53 = vsel %vm550_vm0, %v542_v49, -inf  ;;  %v472_v54 = vadd.f32 %v732_v50, %v397_v39 }
 0x199   :  { %v552_v55 = vrot.slane %v551_v53, 4 }
 0x19a   :  { %v547_v56 = vadd.f32 %v770_v52, %v472_v54 }
 0x19b   :  { %v553_v57 = vmax.f32 %v551_v53, %v552_v55 }
 0x19c   :  { %v558_v58 = vsel %vm550_vm0, %v547_v56, -inf }
 0x19d   :  { %v554_v59 = vrot.slane %v553_v57, 2  ;;  %v559_v60 = vrot.slane %v558_v58, 4 }
 0x19f   :  { %v555_v61 = vmax.f32 %v553_v57, %v554_v59  ;;  %v560_v62 = vmax.f32 %v558_v58, %v559_v60 }
 0x1a1   :  { %v561_v1 = vrot.slane %v560_v62, 2  ;;  %v556_v2 = vrot.slane %v555_v61, 1 }
 0x1a3   :  { %v562_v0 = vmax.f32 %v560_v62, %v561_v1  ;;  %v557_v4 = vmax.f32 %v555_v61, %v556_v2 }
 0x1a5   :  { %v563_v3 = vrot.slane %v562_v0, 1 }
 0x1a7   :  { %v564_v5 = vmax.f32 %v562_v0, %v563_v3 }
 0x1a9   :  { %v568_v6 = vsel %vm567_vm1, %v564_v5, %v557_v4 }
 0x1aa   :  { %571 = vst.msk [vmem:[#allocation5] sm:$0x3] %vm570_vm2, %v568_v6 }
 0x1ab   :  { %939 = shalt.err (!%p936_p12)
}
 0x1ac   :  { %s940_s30 = scalar_lea.hbm %s1064_s2, 32 }
 0x1ad   :  { %p941_p13 = scmp.ne.s32.totalorder %s1064_s2, %s940_s30  ;;  %p944_p0 = scmp.lt.u32.totalorder %s940_s30, %s1064_s2 }
 0x1af   :  { %p946_p1 = pnand %p944_p0, %p941_p13 }
 0x1b1   :  { %949 = shalt.err (!%p946_p1)
}
 0x1b2   :  { %581 = dma.vmem_to_hbm [thread:$0]  %s579_s1, 32, %s1064_s2, [#allocation4]  }
 0x1b3   :  { %952 = dma.done.wait [#allocation4], 32  }
 0x1b4   :  { %953 = vsyncadd [#allocation4], 4294967264 }
 0x1b5   :  { %585 = vsyncpa [#allocation3], 1 }
 0x1b6   :  { %586 = vsyncpa [#allocation4], 1 }

</bundles_post_ra>
